<compile_context>
chip_gen: v7x
topology: tpu7x:2x2x1
jax: 0.10.0
libtpu: 0.0.40
codegen_flags: <defaults>
</compile_context>

<pallas_src>
import functools

import jax
import jax.numpy as jnp
from jax.experimental import pallas as pl
from jax.experimental.pallas import tpu as pltpu


def _round_up(x, m):
    return ((x + m - 1) // m) * m


def _loss_kernel(pred_ref, gt_ref, noise_ref, mask_ref, part_ref, acc_ref, *,
                 W, HW, B):
    """One grid step over a (B, HW) lane-dense slab block.

    acc_ref : (3, 8, HW) f32 VMEM per-lane accumulator, resident across the
              inner ("arbitrary") grid axis: [sum_sq_err, h_tv, w_tv].
    part_ref: (1, 3) SMEM output block, written once at the last inner step.
    mask_ref: (2, 8, HW) f32 -- [0] vertical-pair-valid, [1] horizontal-pair-valid.
    """
    i = pl.program_id(1)

    @pl.when(i == 0)
    def _init():
        acc_ref[...] = jnp.zeros_like(acc_ref)

    p = pred_ref[...].astype(jnp.float32)     # (B, HW)
    g = gt_ref[...].astype(jnp.float32)       # (B, HW)
    n = noise_ref[...].astype(jnp.float32)    # (B, HW)

    g8 = B // 8  # (B, HW) -> (g8, 8, HW) is a layout-preserving leading-dim split

    # ---- MSE numerator: per-lane partial sums, pure VALU adds ---------------
    d = p - g
    acc_ref[0] += jnp.sum((d * d).reshape(g8, 8, HW), axis=0)

    # ---- vertical TV: neighbour W lanes ahead (full-vreg roll on XLU slot) --
    if HW > W:  # H > 1
        dv = pltpu.roll(n, shift=HW - W, axis=1) - n   # rolled[:, j] = n[:, (j+W) % HW]
        acc_ref[1] += jnp.sum((dv * dv).reshape(g8, 8, HW), axis=0) * mask_ref[0]

    # ---- horizontal TV: next lane, row-boundary pairs masked out ------------
    if W > 1:
        dh = pltpu.roll(n, shift=HW - 1, axis=1) - n   # rolled[:, j] = n[:, (j+1) % HW]
        acc_ref[2] += jnp.sum((dh * dh).reshape(g8, 8, HW), axis=0) * mask_ref[1]

    # ---- single cross-lane/sublane tree reduce at the very end --------------
    @pl.when(i == pl.num_programs(1) - 1)
    def _finalize():
        part_ref[0, 0] = jnp.sum(acc_ref[0])
        part_ref[0, 1] = jnp.sum(acc_ref[1])
        part_ref[0, 2] = jnp.sum(acc_ref[2])


def fixed_loss2(out_image, gt_image, est_noise, if_asym=None):
    """Pallas TPU implementation of fixed_loss2.forward.

    `if_asym` is accepted but unused, exactly as in the PyTorch module.
    """
    del if_asym
    N, C, H, W = out_image.shape
    assert gt_image.shape == (N, C, H, W)
    assert est_noise.shape == (N, C, H, W)

    NC, HW = N * C, H * W
    total_elems = N * C * H * W
    # NOTE: counts intentionally exclude the batch dim, matching _tensor_size.
    count_h = C * (H - 1) * W
    count_w = C * H * (W - 1)

    # ---- lane-dense flattening: one (n, c) slab per row, W folded into lanes
    out2 = out_image.reshape(NC, HW)
    gt2 = gt_image.reshape(NC, HW)
    noise2 = est_noise.reshape(NC, HW)
    itemsize = int(out2.dtype.itemsize)

    # ---- hardware-aware block sizing ----------------------------------------
    try:
        vmem_cap = int(pltpu.get_tpu_info().vmem_capacity_bytes)
    except Exception:  # conservative fallback (v7x physical VMEM)
        vmem_cap = 64 * 1024 * 1024
    try:
        device_kind = jax.devices()[0].device_kind.lower()
    except Exception:
        device_kind = ""
    # ~4 MiB/input blocks on v6e/v7x (amortize per-step overhead vs fast HBM);
    # v5e is already near its roofline at 1-2 MiB, so keep it smaller there.
    target_block_bytes = min(4 << 20, max(1 << 20, vmem_cap // 24))
    if "v5" in device_kind:
        target_block_bytes = min(target_block_bytes, 2 << 20)

    slab_bytes = HW * max(itemsize, 1)
    NC8 = _round_up(NC, 8)
    B = max(8, (max(1, target_block_bytes // slab_bytes) // 8) * 8)
    B = min(B, NC8)
    # TODO(synk): for very large images (HW*itemsize >> target_block_bytes) add
    # an HW-tiled path with a W-element halo instead of widening to 8 full slabs.
    if NC8 >= 16:
        # Keep at least 2 blocks so the outer grid axis can split across TCs.
        B = min(B, _round_up((NC8 + 1) // 2, 8))
    num_blocks = -(-NC8 // B)
    if num_blocks > 1 and num_blocks % 2 == 1:
        num_blocks += 1                      # even count -> clean 2-TC split
    NC_pad = num_blocks * B
    if NC_pad != NC:
        pad = ((0, NC_pad - NC), (0, 0))     # zero slabs contribute exactly 0
        out2 = jnp.pad(out2, pad)
        gt2 = jnp.pad(gt2, pad)
        noise2 = jnp.pad(noise2, pad)

    g_outer = 2 if num_blocks % 2 == 0 else 1
    g_inner = num_blocks // g_outer

    # ---- full-length 0/1 masks, pre-tiled to 8 sublanes ----------------------
    j = jnp.arange(HW, dtype=jnp.int32)
    vmask = (j < (HW - W)).astype(jnp.float32)        # vertical pair in-bounds
    hmask = (j % W != (W - 1)).astype(jnp.float32)    # pair stays inside a row
    masks = jnp.stack([jnp.broadcast_to(vmask, (8, HW)),
                       jnp.broadcast_to(hmask, (8, HW))])   # (2, 8, HW)

    kernel = functools.partial(_loss_kernel, W=W, HW=HW, B=B)

    data_spec = pl.BlockSpec((B, HW), lambda o, i: (o * g_inner + i, 0))
    mask_spec = pl.BlockSpec((2, 8, HW), lambda o, i: (0, 0, 0))

    block_bytes = B * HW * itemsize
    acc_bytes = 3 * 8 * HW * 4
    mask_bytes = 2 * 8 * HW * 4
    need = 3 * 2 * block_bytes + acc_bytes + 2 * mask_bytes + (1 << 20)
    vmem_limit = int(min(vmem_cap, max(32 << 20, int(need * 1.25))))

    partials = pl.pallas_call(
        kernel,
        out_shape=jax.ShapeDtypeStruct((g_outer, 3), jnp.float32),
        grid_spec=pltpu.PrefetchScalarGridSpec(
            num_scalar_prefetch=0,
            grid=(g_outer, g_inner),
            in_specs=[data_spec, data_spec, data_spec, mask_spec],
            out_specs=pl.BlockSpec((1, 3), lambda o, i: (o, 0),
                                   memory_space=pltpu.SMEM),
            scratch_shapes=[pltpu.VMEM((3, 8, HW), jnp.float32)],
        ),
        compiler_params=pltpu.CompilerParams(
            dimension_semantics=("parallel", "arbitrary"),
            vmem_limit_bytes=vmem_limit),
    )(out2, gt2, noise2, masks)

    sums = jnp.sum(partials, axis=0)      # [sum_sq_err, h_tv, w_tv]
    l2 = sums[0] / jnp.float32(total_elems)
    tv = sums[1] / jnp.float32(count_h) + sums[2] / jnp.float32(count_w)
    return l2 + jnp.float32(0.05) * tv


def _reference(out_image, gt_image, est_noise):
    out_image = out_image.astype(jnp.float32)
    gt_image = gt_image.astype(jnp.float32)
    est_noise = est_noise.astype(jnp.float32)
    l2 = jnp.mean((out_image - gt_image) ** 2)
    N, C, H, W = est_noise.shape
    count_h = C * (H - 1) * W
    count_w = C * H * (W - 1)
    h_tv = jnp.sum((est_noise[:, :, 1:, :] - est_noise[:, :, :-1, :]) ** 2)
    w_tv = jnp.sum((est_noise[:, :, :, 1:] - est_noise[:, :, :, :-1]) ** 2)
    return l2 + 0.05 * (h_tv / count_h + w_tv / count_w)


if __name__ == "__main__":
    key = jax.random.PRNGKey(0)
    k1, k2, k3, k4 = jax.random.split(key, 4)
    N, C, H, W = 2, 4, 16, 16
    out_image = jax.random.normal(k1, (N, C, H, W), dtype=jnp.float32)
    gt_image = jax.random.normal(k2, (N, C, H, W), dtype=jnp.float32)
    est_noise = jax.random.normal(k3, (N, C, H, W), dtype=jnp.float32)
    if_asym = jax.random.uniform(k4, (N, 1, H, W), dtype=jnp.float32)  # unused

    loss = jax.block_until_ready(fixed_loss2(out_image, gt_image, est_noise, if_asym))
    ref = jax.block_until_ready(_reference(out_image, gt_image, est_noise))
    assert jnp.allclose(loss, ref, rtol=1e-5, atol=1e-5), (loss, ref)
    print("KERNEL_OK")
</pallas_src>

<mosaic_0001>
module attributes {stable_mosaic.version = 11 : i64} {
  func.func @_loss_kernel(%arg0: i32, %arg1: i32, %arg2: memref<8x256xf32, #tpu.memory_space<vmem>>, %arg3: memref<8x256xf32, #tpu.memory_space<vmem>>, %arg4: memref<8x256xf32, #tpu.memory_space<vmem>>, %arg5: memref<2x8x256xf32, #tpu.memory_space<vmem>>, %arg6: memref<1x3xf32, #tpu.memory_space<smem>>, %arg7: memref<3x8x256xf32, #tpu.memory_space<vmem>>) attributes {dimension_semantics = [#tpu.dimension_semantics<parallel>, #tpu.dimension_semantics<arbitrary>], iteration_bounds = array<i64: 1, 1>, scalar_prefetch = 0 : i64, scratch_operands = 1 : i64, tpu.core_type = #tpu.core_type<tc>, window_params = [{transform_indices = @transform_0, window_bounds = array<i64: 8, 256>}, {transform_indices = @transform_1, window_bounds = array<i64: 8, 256>}, {transform_indices = @transform_2, window_bounds = array<i64: 8, 256>}, {pipeline_mode = #tpu.pipeline_mode<synchronous>, transform_indices = @transform_3, window_bounds = array<i64: 2, 8, 256>}, {transform_indices = @transform_4, window_bounds = array<i64: 1, 3>}]} {
    %c0_i32 = arith.constant 0 : i32
    %0 = arith.cmpi eq, %arg1, %c0_i32 : i32
    %1 = arith.extui %0 : i1 to i32
    %c0_i32_0 = arith.constant 0 : i32
    %2 = arith.cmpi ne, %1, %c0_i32_0 : i32
    scf.if %2 {
      %cst_32 = arith.constant 0.000000e+00 : f32
      %47 = vector.broadcast %cst_32 : f32 to vector<3x8x256xf32>
      %c0_33 = arith.constant 0 : index
      %c0_34 = arith.constant 0 : index
      %c0_35 = arith.constant 0 : index
      %48 = vector.load %arg7[%c0_33, %c0_34, %c0_35] : memref<3x8x256xf32, #tpu.memory_space<vmem>>, vector<3x8x256xf32>
      tpu.vector_store %arg7[%c0_33, %c0_34, %c0_35], %47 {strides = array<i32>} : memref<3x8x256xf32, #tpu.memory_space<vmem>>, vector<3x8x256xf32>,
    } else {
    }
    %c0 = arith.constant 0 : index
    %c0_1 = arith.constant 0 : index
    %3 = vector.load %arg2[%c0, %c0_1] : memref<8x256xf32, #tpu.memory_space<vmem>>, vector<8x256xf32>
    %c0_2 = arith.constant 0 : index
    %c0_3 = arith.constant 0 : index
    %4 = vector.load %arg3[%c0_2, %c0_3] : memref<8x256xf32, #tpu.memory_space<vmem>>, vector<8x256xf32>
    %c0_4 = arith.constant 0 : index
    %c0_5 = arith.constant 0 : index
    %5 = vector.load %arg4[%c0_4, %c0_5] : memref<8x256xf32, #tpu.memory_space<vmem>>, vector<8x256xf32>
    %6 = arith.subf %3, %4 : vector<8x256xf32>
    %c0_6 = arith.constant 0 : index
    %c0_7 = arith.constant 0 : index
    %c0_8 = arith.constant 0 : index
    %7 = vector.load %arg7[%c0_6, %c0_7, %c0_8] : memref<3x8x256xf32, #tpu.memory_space<vmem>>, vector<1x8x256xf32>
    %8 = vector.shape_cast %7 : vector<1x8x256xf32> to vector<8x256xf32>
    %9 = arith.mulf %6, %6 : vector<8x256xf32>
    %10 = vector.shape_cast %9 : vector<8x256xf32> to vector<1x8x256xf32>
    %cst = arith.constant dense<0.000000e+00> : vector<8x256xf32>
    %11 = vector.multi_reduction <add>, %10, %cst [0] : vector<1x8x256xf32> to vector<8x256xf32>
    %12 = arith.addf %8, %11 : vector<8x256xf32>
    %c0_9 = arith.constant 0 : index
    %c0_10 = arith.constant 0 : index
    %c0_11 = arith.constant 0 : index
    %13 = vector.load %arg7[%c0_9, %c0_10, %c0_11] : memref<3x8x256xf32, #tpu.memory_space<vmem>>, vector<1x8x256xf32>
    %14 = vector.shape_cast %13 : vector<1x8x256xf32> to vector<8x256xf32>
    %15 = vector.shape_cast %12 : vector<8x256xf32> to vector<1x8x256xf32>
    tpu.vector_store %arg7[%c0_9, %c0_10, %c0_11], %15 {strides = array<i32>} : memref<3x8x256xf32, #tpu.memory_space<vmem>>, vector<1x8x256xf32>,
    %c240_i32 = arith.constant 240 : i32
    %16 = tpu.dynamic_rotate %5 by %c240_i32 dim 1 : vector<8x256xf32>, i32 -> vector<8x256xf32>
    %17 = arith.subf %16, %5 : vector<8x256xf32>
    %c1 = arith.constant 1 : index
    %c0_12 = arith.constant 0 : index
    %c0_13 = arith.constant 0 : index
    %18 = vector.load %arg7[%c1, %c0_12, %c0_13] : memref<3x8x256xf32, #tpu.memory_space<vmem>>, vector<1x8x256xf32>
    %19 = vector.shape_cast %18 : vector<1x8x256xf32> to vector<8x256xf32>
    %20 = arith.mulf %17, %17 : vector<8x256xf32>
    %21 = vector.shape_cast %20 : vector<8x256xf32> to vector<1x8x256xf32>
    %cst_14 = arith.constant dense<0.000000e+00> : vector<8x256xf32>
    %22 = vector.multi_reduction <add>, %21, %cst_14 [0] : vector<1x8x256xf32> to vector<8x256xf32>
    %c0_15 = arith.constant 0 : index
    %c0_16 = arith.constant 0 : index
    %c0_17 = arith.constant 0 : index
    %23 = vector.load %arg5[%c0_15, %c0_16, %c0_17] : memref<2x8x256xf32, #tpu.memory_space<vmem>>, vector<1x8x256xf32>
    %24 = vector.shape_cast %23 : vector<1x8x256xf32> to vector<8x256xf32>
    %25 = arith.mulf %22, %24 : vector<8x256xf32>
    %26 = arith.addf %19, %25 : vector<8x256xf32>
    %c1_18 = arith.constant 1 : index
    %c0_19 = arith.constant 0 : index
    %c0_20 = arith.constant 0 : index
    %27 = vector.load %arg7[%c1_18, %c0_19, %c0_20] : memref<3x8x256xf32, #tpu.memory_space<vmem>>, vector<1x8x256xf32>
    %28 = vector.shape_cast %27 : vector<1x8x256xf32> to vector<8x256xf32>
    %29 = vector.shape_cast %26 : vector<8x256xf32> to vector<1x8x256xf32>
    tpu.vector_store %arg7[%c1_18, %c0_19, %c0_20], %29 {strides = array<i32>} : memref<3x8x256xf32, #tpu.memory_space<vmem>>, vector<1x8x256xf32>,
    %c255_i32 = arith.constant 255 : i32
    %30 = tpu.dynamic_rotate %5 by %c255_i32 dim 1 : vector<8x256xf32>, i32 -> vector<8x256xf32>
    %31 = arith.subf %30, %5 : vector<8x256xf32>
    %c2 = arith.constant 2 : index
    %c0_21 = arith.constant 0 : index
    %c0_22 = arith.constant 0 : index
    %32 = vector.load %arg7[%c2, %c0_21, %c0_22] : memref<3x8x256xf32, #tpu.memory_space<vmem>>, vector<1x8x256xf32>
    %33 = vector.shape_cast %32 : vector<1x8x256xf32> to vector<8x256xf32>
    %34 = arith.mulf %31, %31 : vector<8x256xf32>
    %35 = vector.shape_cast %34 : vector<8x256xf32> to vector<1x8x256xf32>
    %cst_23 = arith.constant dense<0.000000e+00> : vector<8x256xf32>
    %36 = vector.multi_reduction <add>, %35, %cst_23 [0] : vector<1x8x256xf32> to vector<8x256xf32>
    %c1_24 = arith.constant 1 : index
    %c0_25 = arith.constant 0 : index
    %c0_26 = arith.constant 0 : index
    %37 = vector.load %arg5[%c1_24, %c0_25, %c0_26] : memref<2x8x256xf32, #tpu.memory_space<vmem>>, vector<1x8x256xf32>
    %38 = vector.shape_cast %37 : vector<1x8x256xf32> to vector<8x256xf32>
    %39 = arith.mulf %36, %38 : vector<8x256xf32>
    %40 = arith.addf %33, %39 : vector<8x256xf32>
    %c2_27 = arith.constant 2 : index
    %c0_28 = arith.constant 0 : index
    %c0_29 = arith.constant 0 : index
    %41 = vector.load %arg7[%c2_27, %c0_28, %c0_29] : memref<3x8x256xf32, #tpu.memory_space<vmem>>, vector<1x8x256xf32>
    %42 = vector.shape_cast %41 : vector<1x8x256xf32> to vector<8x256xf32>
    %43 = vector.shape_cast %40 : vector<8x256xf32> to vector<1x8x256xf32>
    tpu.vector_store %arg7[%c2_27, %c0_28, %c0_29], %43 {strides = array<i32>} : memref<3x8x256xf32, #tpu.memory_space<vmem>>, vector<1x8x256xf32>,
    %c0_i32_30 = arith.constant 0 : i32
    %44 = arith.cmpi eq, %arg1, %c0_i32_30 : i32
    %45 = arith.extui %44 : i1 to i32
    %c0_i32_31 = arith.constant 0 : i32
    %46 = arith.cmpi ne, %45, %c0_i32_31 : i32
    scf.if %46 {
      %c0_32 = arith.constant 0 : index
      %c0_33 = arith.constant 0 : index
      %c0_34 = arith.constant 0 : index
      %47 = vector.load %arg7[%c0_32, %c0_33, %c0_34] : memref<3x8x256xf32, #tpu.memory_space<vmem>>, vector<1x8x256xf32>
      %48 = vector.shape_cast %47 : vector<1x8x256xf32> to vector<8x256xf32>
      %49 = vector.shape_cast %48 : vector<8x256xf32> to vector<1x8x256xf32>
      %cst_35 = arith.constant dense<0.000000e+00> : vector<1xf32>
      %50 = vector.multi_reduction <add>, %49, %cst_35 [1, 2] : vector<1x8x256xf32> to vector<1xf32>
      %51 = vector.shape_cast %50 : vector<1xf32> to vector<1x1x1xf32>
      %52 = vector.extract %51[0, 0, 0] : f32 from vector<1x1x1xf32>
      %c0_36 = arith.constant 0 : index
      %c0_37 = arith.constant 0 : index
      %53 = memref.load %arg6[%c0_36, %c0_37] : memref<1x3xf32, #tpu.memory_space<smem>>
      memref.store %52, %arg6[%c0_36, %c0_37] : memref<1x3xf32, #tpu.memory_space<smem>>
      %c1_38 = arith.constant 1 : index
      %c0_39 = arith.constant 0 : index
      %c0_40 = arith.constant 0 : index
      %54 = vector.load %arg7[%c1_38, %c0_39, %c0_40] : memref<3x8x256xf32, #tpu.memory_space<vmem>>, vector<1x8x256xf32>
      %55 = vector.shape_cast %54 : vector<1x8x256xf32> to vector<8x256xf32>
      %56 = vector.shape_cast %55 : vector<8x256xf32> to vector<1x8x256xf32>
      %cst_41 = arith.constant dense<0.000000e+00> : vector<1xf32>
      %57 = vector.multi_reduction <add>, %56, %cst_41 [1, 2] : vector<1x8x256xf32> to vector<1xf32>
      %58 = vector.shape_cast %57 : vector<1xf32> to vector<1x1x1xf32>
      %59 = vector.extract %58[0, 0, 0] : f32 from vector<1x1x1xf32>
      %c0_42 = arith.constant 0 : index
      %c1_43 = arith.constant 1 : index
      %60 = memref.load %arg6[%c0_42, %c1_43] : memref<1x3xf32, #tpu.memory_space<smem>>
      memref.store %59, %arg6[%c0_42, %c1_43] : memref<1x3xf32, #tpu.memory_space<smem>>
      %c2_44 = arith.constant 2 : index
      %c0_45 = arith.constant 0 : index
      %c0_46 = arith.constant 0 : index
      %61 = vector.load %arg7[%c2_44, %c0_45, %c0_46] : memref<3x8x256xf32, #tpu.memory_space<vmem>>, vector<1x8x256xf32>
      %62 = vector.shape_cast %61 : vector<1x8x256xf32> to vector<8x256xf32>
      %63 = vector.shape_cast %62 : vector<8x256xf32> to vector<1x8x256xf32>
      %cst_47 = arith.constant dense<0.000000e+00> : vector<1xf32>
      %64 = vector.multi_reduction <add>, %63, %cst_47 [1, 2] : vector<1x8x256xf32> to vector<1xf32>
      %65 = vector.shape_cast %64 : vector<1xf32> to vector<1x1x1xf32>
      %66 = vector.extract %65[0, 0, 0] : f32 from vector<1x1x1xf32>
      %c0_48 = arith.constant 0 : index
      %c2_49 = arith.constant 2 : index
      %67 = memref.load %arg6[%c0_48, %c2_49] : memref<1x3xf32, #tpu.memory_space<smem>>
      memref.store %66, %arg6[%c0_48, %c2_49] : memref<1x3xf32, #tpu.memory_space<smem>>
    } else {
    }
    return
  }
  func.func @transform_0(%arg0: i32, %arg1: i32) -> (i32, i32) {
    %c1_i32 = arith.constant 1 : i32
    %0 = arith.muli %arg0, %c1_i32 : i32
    %1 = arith.addi %0, %arg1 : i32
    %c0_i32 = arith.constant 0 : i32
    %c0_i32_0 = arith.constant 0 : i32
    return %1, %c0_i32 : i32, i32
  }
  func.func @transform_1(%arg0: i32, %arg1: i32) -> (i32, i32) {
    %c1_i32 = arith.constant 1 : i32
    %0 = arith.muli %arg0, %c1_i32 : i32
    %1 = arith.addi %0, %arg1 : i32
    %c0_i32 = arith.constant 0 : i32
    %c0_i32_0 = arith.constant 0 : i32
    return %1, %c0_i32 : i32, i32
  }
  func.func @transform_2(%arg0: i32, %arg1: i32) -> (i32, i32) {
    %c1_i32 = arith.constant 1 : i32
    %0 = arith.muli %arg0, %c1_i32 : i32
    %1 = arith.addi %0, %arg1 : i32
    %c0_i32 = arith.constant 0 : i32
    %c0_i32_0 = arith.constant 0 : i32
    return %1, %c0_i32 : i32, i32
  }
  func.func @transform_3(%arg0: i32, %arg1: i32) -> (i32, i32, i32) {
    %c0_i32 = arith.constant 0 : i32
    %c0_i32_0 = arith.constant 0 : i32
    %c0_i32_1 = arith.constant 0 : i32
    %c0_i32_2 = arith.constant 0 : i32
    return %c0_i32, %c0_i32_0, %c0_i32_1 : i32, i32, i32
  }
  func.func @transform_4(%arg0: i32, %arg1: i32) -> (i32, i32) {
    %c0_i32 = arith.constant 0 : i32
    %c0_i32_0 = arith.constant 0 : i32
    return %arg0, %c0_i32 : i32, i32
  }
}

</mosaic_0001>

<bundles_post_ra>
// kernel: tpu_custom_call.1
= control target key start
LH: loop header
LB: loop body
LE: loop exit
PB: predicated region body
PF: predicated region fallthrough
CT: control target
= control target key end

     0   :  { %9 = vsyncpa [#allocation4], 0  ;;  %s444_s0 = inlined_call_operand.hbm [shape: f32[8,256], index: 0, kind: input, shape index: {}]   ;;  %s445_s1 = inlined_call_operand.hbm [shape: f32[8,256], index: 1, kind: input, shape index: {}]   ;;  %s446_s2 = inlined_call_operand.hbm [shape: f32[8,256], index: 2, kind: input, shape index: {}]   ;;  %s447_s3 = inlined_call_operand.hbm [shape: f32[2,8,256], index: 3, kind: input, shape index: {}]   ;;  %s448_s4 = inlined_call_operand.hbm [shape: f32[1,3], index: 4, kind: output, shape index: {}]  }
   0x1   :  { %10 = vsyncpa [#allocation7], 0 }
   0x2   :  { %11 = vsyncpa [#allocation10], 0 }
   0x3   :  { %12 = vsyncpa [#allocation5], 0  ;;  %s343_s15 = smov [#allocation6]   ;;  %s344_s17 = smov [#allocation3]  }
   0x4   :  { %s37_s16 = sshll.u32 %s343_s15, 4  ;;  %s23_s18 = sshll.u32 %s344_s17, 4  ;;  %s38_s16 = int_to_ptr.vmem [resolvable:$true] %s37_s16  ;;  %s24_s18 = int_to_ptr.vmem [resolvable:$true] %s23_s18 }
   0x5   :  { %s237_s21 = scalar_lea.hbm %s445_s1, 256 }
   0x6   :  { %p238_p0 = scmp.ne.s32.totalorder %s445_s1, %s237_s21  ;;  %p241_p1 = scmp.lt.u32.totalorder %s237_s21, %s445_s1 }
   0x8   :  { %p243_p2 = pnand %p241_p1, %p238_p0 }
   0xa   :  { %246 = shalt.err (!%p243_p2)
}
   0xb   :  { %s247_s26 = scalar_lea.vmem %s38_s16, 256  ;;  %p252_p4 = scmp.lt.s32.totalorder %s38_s16, %s38_s16 }
   0xc   :  { %p248_p3 = scmp.ne.s32.totalorder %s38_s16, %s247_s26  ;;  %p253_p5 = scmp.lt.s32.totalorder %s247_s26, %s247_s26 }
   0xe   :  { %p254_p6 = por %p253_p5, %p252_p4 }
  0x10   :  { %p255_p7 = pnand %p254_p6, %p248_p3 }
  0x12   :  { %258 = shalt.err (!%p255_p7)
}
  0x13   :  { %40 = dma.hbm_to_vmem [thread:$0]  %s445_s1, 256, %s38_s16, [#allocation7]  }
  0x14   :  { %s259_s5 = scalar_lea.hbm %s444_s0, 256 }
  0x15   :  { %p260_p8 = scmp.ne.s32.totalorder %s444_s0, %s259_s5  ;;  %p263_p9 = scmp.lt.u32.totalorder %s259_s5, %s444_s0 }
  0x17   :  { %p265_p10 = pnand %p263_p9, %p260_p8 }
  0x19   :  { %268 = shalt.err (!%p265_p10)
}
  0x1a   :  { %s269_s10 = scalar_lea.vmem %s24_s18, 256  ;;  %p274_p12 = scmp.lt.s32.totalorder %s24_s18, %s24_s18 }
  0x1b   :  { %p270_p11 = scmp.ne.s32.totalorder %s24_s18, %s269_s10  ;;  %p275_p13 = scmp.lt.s32.totalorder %s269_s10, %s269_s10 }
  0x1d   :  { %p276_p0 = por %p275_p13, %p274_p12 }
  0x1f   :  { %p277_p1 = pnand %p276_p0, %p270_p11 }
  0x21   :  { %280 = shalt.err (!%p277_p1)
}
  0x22   :  { %26 = dma.hbm_to_vmem [thread:$0]  %s444_s0, 256, %s24_s18, [#allocation4]  }
  0x23   :  { %s345_s12 = smov [#allocation8]   ;;  %s346_s14 = smov [#allocation9]  }
  0x24   :  { %s51_s13 = sshll.u32 %s345_s12, 4  ;;  %s60_s15 = sshll.u32 %s346_s14, 4  ;;  %s52_s13 = int_to_ptr.vmem [resolvable:$true] %s51_s13  ;;  %s401_s15 = int_to_ptr.vmem [resolvable:$true] %s60_s15 }
  0x25   :  { %s281_s19 = scalar_lea.hbm %s446_s2, 256 }
  0x26   :  { %p282_p2 = scmp.ne.s32.totalorder %s446_s2, %s281_s19  ;;  %p285_p3 = scmp.lt.u32.totalorder %s281_s19, %s446_s2 }
  0x28   :  { %p287_p4 = pnand %p285_p3, %p282_p2 }
  0x2a   :  { %290 = shalt.err (!%p287_p4)
}
  0x2b   :  { %s291_s0 = scalar_lea.vmem %s52_s13, 256  ;;  %p296_p6 = scmp.lt.s32.totalorder %s52_s13, %s52_s13 }
  0x2c   :  { %p292_p5 = scmp.ne.s32.totalorder %s52_s13, %s291_s0  ;;  %p297_p7 = scmp.lt.s32.totalorder %s291_s0, %s291_s0 }
  0x2e   :  { %p298_p8 = por %p297_p7, %p296_p6 }
  0x30   :  { %p299_p9 = pnand %p298_p8, %p292_p5 }
  0x32   :  { %302 = shalt.err (!%p299_p9)
}
  0x33   :  { %54 = dma.hbm_to_vmem [thread:$0]  %s446_s2, 256, %s52_s13, [#allocation7]  }
  0x34   :  { %s303_s27 = scalar_lea.hbm %s447_s3, 512 }
  0x35   :  { %p304_p10 = scmp.ne.s32.totalorder %s447_s3, %s303_s27  ;;  %p307_p11 = scmp.lt.u32.totalorder %s303_s27, %s447_s3 }
  0x37   :  { %p309_p12 = pnand %p307_p11, %p304_p10 }
  0x39   :  { %312 = shalt.err (!%p309_p12)
}
  0x3a   :  { %s313_s6 = scalar_lea.vmem %s401_s15, 512  ;;  %p318_p0 = scmp.lt.s32.totalorder %s401_s15, %s401_s15 }
  0x3b   :  { %p314_p13 = scmp.ne.s32.totalorder %s401_s15, %s313_s6  ;;  %p319_p1 = scmp.lt.s32.totalorder %s313_s6, %s313_s6 }
  0x3d   :  { %p320_p2 = por %p319_p1, %p318_p0 }
  0x3f   :  { %p321_p3 = pnand %p320_p2, %p314_p13 }
  0x41   :  { %324 = shalt.err (!%p321_p3)
}
  0x42   :  { %s347_s2 = smov 256   ;;  %s348_s7 = smov 16  }
  0x43   :  { %66 = dma.hbm_to_vmem [thread:$0]  %s447_s3, 512, %s401_s15, [#allocation10], %s347_s2, %s347_s2, %s348_s7  }
  0x44   :  { %335 = dma.done.wait [#allocation4], 256  }
  0x45   :  { %336 = vsyncadd [#allocation4], 4294967040 }
  0x46   :  { %337 = dma.done.wait [#allocation7], 512  }
  0x47   :  { %338 = vsyncadd [#allocation7], 4294966784 }
  0x48   :  { %339 = dma.done.wait [#allocation10], 512  }
  0x49   :  { %340 = vsyncadd [#allocation10], 4294966784  ;;  %v96_v0 = vld [vmem:[#allocation8] sm:$0xff]  ;;  %s349_s10 = smov 127   ;;  %s350_s1 = smov 112   ;;  %v97_v1 = vld [vmem:[#allocation8 + $0x8] sm:$0xff]  ;;  %v114_v11 = vlaneseq }
  0x4a   :  { %136 = vrot.lane.b32.xlu1 %v96_v0, %s349_s10  ;;  %110 = vrot.lane.b32.xlu0 %v96_v0, %s350_s1  ;;  %v92_v2 = vld [vmem:[#allocation3] sm:$0xff]  ;;  %v93_v3 = vld [vmem:[#allocation3 + $0x8] sm:$0xff]  ;;  %v94_v4 = vld [vmem:[#allocation6] sm:$0xff]  ;;  %s325_s15 = scalar_lea.hbm %s448_s4, 16 }
  0x4b   :  { %v95_v5 = vld [vmem:[#allocation6 + $0x8] sm:$0xff]  ;;  %v98_v6 = vsub.f32 %v92_v2, %v94_v4  ;;  %v115_v12 = vand.u32 127, %v114_v11  ;;  %v128_v25 = vld [vmem:[#allocation9] sm:$0xff]  ;;  %v153_v27 = vld [vmem:[#allocation9 + $0x10] sm:$0xff]  ;;  %p326_p4 = scmp.ne.s32.totalorder %s448_s4, %s325_s15  ;;  %p329_p5 = scmp.lt.u32.totalorder %s325_s15, %s448_s4 }
  0x4c   :  { %v99_v7 = vsub.f32 %v93_v3, %v95_v5  ;;  %v129_v26 = vld [vmem:[#allocation9 + $0x8] sm:$0xff]  ;;  %v154_v28 = vld [vmem:[#allocation9 + $0x18] sm:$0xff] }
  0x4d   :  { %v102_v8 = vmul.f32 %v98_v6, %v98_v6  ;;  %vm140_vm0 = vcmp.lt.s32.totalorder %v115_v12, 127  ;;  %vm116_vm1 = vcmp.lt.s32.totalorder %v115_v12, 112  ;;  %p331_p6 = pnand %p329_p5, %p326_p4 }
  0x4e   :  { %138 = vrot.lane.b32.xlu1 %v97_v1, %s349_s10  ;;  %112 = vrot.lane.b32.xlu0 %v97_v1, %s350_s1  ;;  %v103_v9 = vmul.f32 %v99_v7, %v99_v7 }
  0x50   :  { %v166_v10 = vadd.f32 %v103_v9, %v102_v8 }
  0x6d   :  { %167 = vadd.xlane.f32.xlu0 %v166_v10 }
  0xbc   :  { %v137_v13 = vpop.permute.xlu1 %136  ;;  %v111_v14 = vpop.permute.xlu0 %110 }
  0xc0   :  { %v139_v15 = vpop.permute.xlu1 %138  ;;  %v113_v16 = vpop.permute.xlu0 %112 }
  0xc1   :  { %v141_v17 = vsel %vm140_vm0, %v137_v13, %v139_v15  ;;  %v142_v18 = vsel %vm140_vm0, %v139_v15, %v137_v13  ;;  %v117_v19 = vsel %vm116_vm1, %v111_v14, %v113_v16  ;;  %v118_v20 = vsel %vm116_vm1, %v113_v16, %v111_v14 }
  0xc2   :  { %v143_v21 = vsub.f32 %v141_v17, %v96_v0  ;;  %v144_v22 = vsub.f32 %v142_v18, %v97_v1  ;;  %v119_v23 = vsub.f32 %v117_v19, %v96_v0  ;;  %v120_v24 = vsub.f32 %v118_v20, %v97_v1 }
  0xc4   :  { %v148_v29 = vmul.f32 %v143_v21, %v143_v21  ;;  %v149_v30 = vmul.f32 %v144_v22, %v144_v22  ;;  %v124_v31 = vmul.f32 %v119_v23, %v119_v23  ;;  %v125_v32 = vmul.f32 %v120_v24, %v120_v24 }
  0xc6   :  { %v130_v33 = vmul.f32 %v128_v25, %v124_v31  ;;  %v131_v34 = vmul.f32 %v129_v26, %v125_v32  ;;  %v155_v35 = vmul.f32 %v153_v27, %v148_v29  ;;  %v156_v36 = vmul.f32 %v154_v28, %v149_v30 }
  0xc8   :  { %v180_v37 = vadd.f32 %v131_v34, %v130_v33  ;;  %v194_v38 = vadd.f32 %v156_v36, %v155_v35 }
  0xca   :  { %181 = vadd.xlane.f32.xlu1 %v180_v37  ;;  %195 = vadd.xlane.f32.xlu0 %v194_v38 }
  0xfa   :  { %v168_v39 = vpop.xlane.xlu0 %167 }
  0xfb   :  { %v169_v40 = vrot.slane %v168_v39, 4 }
  0xfd   :  { %v170_v41 = vadd.f32 %v169_v40, %v168_v39 }
  0xff   :  { %v171_v42 = vrot.slane %v170_v41, 2 }
 0x101   :  { %v172_v43 = vadd.f32 %v171_v42, %v170_v41 }
 0x103   :  { %v173_v44 = vrot.slane %v172_v43, 1 }
 0x105   :  { %v174_v45 = vadd.f32 %v173_v44, %v172_v43 }
 0x107   :  { %222 = vpush %v174_v45 }
 0x138   :  { %s223_s3 = spop %222 }
 0x139   :  { %177 = sst [smem:[#allocation11]] %s223_s3 }
 0x157   :  { %v182_v46 = vpop.xlane.xlu1 %181  ;;  %v196_v47 = vpop.xlane.xlu0 %195 }
 0x158   :  { %v183_v48 = vrot.slane %v182_v46, 4  ;;  %v197_v49 = vrot.slane %v196_v47, 4 }
 0x15a   :  { %v184_v50 = vadd.f32 %v183_v48, %v182_v46  ;;  %v198_v51 = vadd.f32 %v197_v49, %v196_v47 }
 0x15c   :  { %v185_v52 = vrot.slane %v184_v50, 2  ;;  %v199_v53 = vrot.slane %v198_v51, 2 }
 0x15e   :  { %v186_v54 = vadd.f32 %v185_v52, %v184_v50  ;;  %v200_v55 = vadd.f32 %v199_v53, %v198_v51 }
 0x160   :  { %v187_v56 = vrot.slane %v186_v54, 1  ;;  %v201_v57 = vrot.slane %v200_v55, 1 }
 0x162   :  { %v188_v58 = vadd.f32 %v187_v56, %v186_v54  ;;  %v202_v59 = vadd.f32 %v201_v57, %v200_v55 }
 0x164   :  { %224 = vpush %v188_v58 }
 0x165   :  { %226 = vpush %v202_v59 }
 0x195   :  { %s225_s11 = spop %224 }
 0x196   :  { %191 = sst [smem:[#allocation11 + $0x1]] %s225_s11  ;;  %s227_s12 = spop %226 }
 0x197   :  { %205 = sst [smem:[#allocation11 + $0x2]] %s227_s12 }
 0x198   :  { %334 = shalt.err (!%p331_p6)
}
 0x199   :  { %s351_s21 = smov [#allocation11]  }
 0x19a   :  { %213 = dma.smem_to_hbm %s351_s21, 16, %s448_s4, [#allocation5]  }
 0x19b   :  { %341 = dma.done.wait [#allocation5], 16  }
 0x19c   :  { %342 = vsyncadd [#allocation5], 4294967280 }
 0x19d   :  { %217 = sfence }
 0x19e   :  { %218 = vsyncpa [#allocation4], 1 }
 0x19f   :  { %219 = vsyncpa [#allocation7], 1 }
 0x1a0   :  { %220 = vsyncpa [#allocation10], 1 }
 0x1a1   :  { %221 = vsyncpa [#allocation5], 1 }

</bundles_post_ra>
